<compile_context>
chip_gen: v7x
topology: tpu7x:2x2x1
jax: 0.10.0
libtpu: 0.0.40
codegen_flags: <defaults>
</compile_context>

<pallas_src>
import functools

import jax
import jax.numpy as jnp
from jax import lax
from jax.experimental import pallas as pl
from jax.experimental.pallas import tpu as pltpu


# ---------------------------------------------------------------------------
# Helpers
# ---------------------------------------------------------------------------
_TK_CAP = 4096  # max K tile (lane-aligned); actual tile also bounded by VMEM budget


def _round_up(x, m):
    return ((x + m - 1) // m) * m


def _flatten(x):
    b, h, w, f = x.shape
    return x.reshape(b * h, w * f), b, h, w, f


def _vmem_budget(override=None):
    """Per-generation scoped-VMEM budget (bytes)."""
    if override is not None:
        return int(override)
    try:
        cap = int(pltpu.get_tpu_info().vmem_capacity_bytes)
    except Exception:
        cap = 64 * 1024 * 1024  # conservative fallback (v7x per-TC physical VMEM)
    # ~48 MiB on v7x (64 MiB physical per TC), ~96 MiB on v5e/v6e (128 MiB).
    return min(cap * 3 // 4, 96 * 1024 * 1024)


def _k_tiling(k, cap):
    """Return (kp, tk, nk).  Single full-K tile (no padding) when k <= cap."""
    if k <= cap:
        return k, k, 1
    nk = -(-k // cap)
    tk = _round_up(-(-k // nk), 128)   # balanced, lane-aligned
    kp = tk * nk
    return kp, tk, nk


def _resident_plan(m, k, itemsize, budget):
    """(kp, tk, nk) for the single-M-tile (resident accumulator) plan, or None."""
    sub = max(8, 32 // itemsize)                       # sublane multiple for dtype
    # acc + target/out (+ spare) f32 residents, layout-padded.
    fixed = 3 * _round_up(m, 8) * _round_up(m, 128) * 4
    avail = int(budget * 0.8) - fixed
    if avail <= 0:
        return None

    def in_bytes(tk_):
        # single feats input, double-buffered, layout-padded
        return 2 * _round_up(m, sub) * _round_up(tk_, 128) * itemsize

    kp, tk, nk = _k_tiling(k, _TK_CAP)
    while in_bytes(tk) > avail and tk > 512:
        tk = max(512, _round_up(tk // 2, 128))
        nk = -(-k // tk)
        kp = tk * nk
    if in_bytes(tk) > avail:
        return None
    return kp, tk, nk


def _tiled_plan(m, k, itemsize, budget, tile_m=None):
    """Tile sizes for the upper-triangular pair grid."""
    sub = max(8, 32 // itemsize)
    if tile_m is not None:
        tmn = tile_m                       # testing / expert override
    elif m <= 512:
        tmn = _round_up(m, sub)            # single M tile -> minimal padding
    else:
        tmn = 512                          # big tiles -> high arithmetic intensity
    mp = _round_up(m, tmn)
    nti = mp // tmn
    # K tile bounded by the per-generation VMEM budget (2 operands x 2 buffers).
    fixed = 3 * tmn * tmn * 4 + (1 << 20)
    avail = max(int(budget * 0.8) - fixed, 4 * tmn * 128 * itemsize)
    tk_cap = max(128, min(_TK_CAP, (avail // (4 * tmn * itemsize)) // 128 * 128))
    kp, tk, nk = _k_tiling(k, tk_cap)
    return tmn, mp, nti, tk, kp, nk


def _upper_pairs(nti):
    pairs = [(i, j) for i in range(nti) for j in range(i, nti)]
    ii = jnp.array([p[0] for p in pairs], dtype=jnp.int32)
    jj = jnp.array([p[1] for p in pairs], dtype=jnp.int32)
    return ii, jj, len(pairs)


# ---------------------------------------------------------------------------
# Kernels
# ---------------------------------------------------------------------------
def _gram_resident_kernel(f_ref, g_ref, acc_ref, *, inv_gram_denom):
    """G = F F^T with the whole (M, M) accumulator resident; grid over K only."""
    kk = pl.program_id(0)

    @pl.when(kk == 0)
    def _():
        acc_ref[...] = jnp.zeros_like(acc_ref)

    f = f_ref[...]
    acc_ref[...] += lax.dot_general(
        f, f, dimension_numbers=(((1,), (1,)), ((), ())),
        preferred_element_type=jnp.float32)

    @pl.when(kk == pl.num_programs(0) - 1)
    def _():
        g_ref[...] = (acc_ref[...] * inv_gram_denom).astype(g_ref.dtype)


def _loss_resident_kernel(f_ref, t_ref, part_ref, acc_ref, *, inv_gram_denom):
    """Fused Gram + MSE partial; emits a (1, M) lane vector (no Gram writeback)."""
    kk = pl.program_id(0)

    @pl.when(kk == 0)
    def _():
        acc_ref[...] = jnp.zeros_like(acc_ref)

    f = f_ref[...]
    acc_ref[...] += lax.dot_general(
        f, f, dimension_numbers=(((1,), (1,)), ((), ())),
        preferred_element_type=jnp.float32)

    @pl.when(kk == pl.num_programs(0) - 1)
    def _():
        d = acc_ref[...] * inv_gram_denom - t_ref[...]
        # sublane-only reduce; cross-lane reduce happens in the JAX wrapper.
        part_ref[...] = jnp.sum(d * d, axis=0, keepdims=True)


def _gram_pairs_kernel(ii_ref, jj_ref, a_ref, b_ref, g_ref, acc_ref,
                       *, inv_gram_denom):
    """Upper-triangular tile (i<=j) of G; lower tiles mirrored in the wrapper."""
    kk = pl.program_id(1)

    @pl.when(kk == 0)
    def _():
        acc_ref[...] = jnp.zeros_like(acc_ref)

    acc_ref[...] += lax.dot_general(
        a_ref[...], b_ref[...],
        dimension_numbers=(((1,), (1,)), ((), ())),
        preferred_element_type=jnp.float32)

    @pl.when(kk == pl.num_programs(1) - 1)
    def _():
        g_ref[...] = (acc_ref[...] * inv_gram_denom).astype(g_ref.dtype)


def _loss_pairs_kernel(ii_ref, jj_ref, a_ref, b_ref, t_ref, part_ref, acc_ref,
                       *, inv_gram_denom):
    """Fused Gram tile + per-pair MSE partial; off-diagonal pairs weighted 2x."""
    p = pl.program_id(0)
    kk = pl.program_id(1)

    @pl.when(kk == 0)
    def _():
        acc_ref[...] = jnp.zeros_like(acc_ref)

    acc_ref[...] += lax.dot_general(
        a_ref[...], b_ref[...],
        dimension_numbers=(((1,), (1,)), ((), ())),
        preferred_element_type=jnp.float32)

    @pl.when(kk == pl.num_programs(1) - 1)
    def _():
        d = acc_ref[...] * inv_gram_denom - t_ref[...]
        w = jnp.where(ii_ref[p] == jj_ref[p], jnp.float32(1.0), jnp.float32(2.0))
        part_ref[...] = w * jnp.sum(d * d, axis=0, keepdims=True)


# ---------------------------------------------------------------------------
# Wrappers
# ---------------------------------------------------------------------------
def gram_matrix_pallas(x, *, max_vmem_bytes=None, force_tiled=False,
                       tile_m=None, cast_to_bf16=False):
    """Pallas equivalent of gram_matrix() for a BHWF tensor (full G, f32)."""
    feats, b, h, w, f = _flatten(x)
    if cast_to_bf16 and feats.dtype == jnp.float32:
        feats = feats.astype(jnp.bfloat16)   # halves HBM bytes; f32 accumulate
    m, k = feats.shape
    itemsize = feats.dtype.itemsize
    budget = _vmem_budget(max_vmem_bytes)
    inv_gram = 1.0 / float(b * h * w * f)

    plan = None if force_tiled else _resident_plan(m, k, itemsize, budget)
    if plan is not None:
        kp, tk, nk = plan
        feats_p = feats if kp == k else jnp.pad(feats, ((0, 0), (0, kp - k)))
        return pl.pallas_call(
            functools.partial(_gram_resident_kernel, inv_gram_denom=inv_gram),
            out_shape=jax.ShapeDtypeStruct((m, m), jnp.float32),
            grid_spec=pltpu.PrefetchScalarGridSpec(
                num_scalar_prefetch=0, grid=(nk,),
                in_specs=[pl.BlockSpec((m, tk), lambda kk: (0, kk))],
                out_specs=pl.BlockSpec((m, m), lambda kk: (0, 0)),
                scratch_shapes=[pltpu.VMEM((m, m), jnp.float32)]),
            compiler_params=pltpu.CompilerParams(
                dimension_semantics=("arbitrary",),
                vmem_limit_bytes=budget),
            cost_estimate=pl.CostEstimate(
                flops=2 * m * m * kp, transcendentals=0,
                bytes_accessed=feats_p.size * itemsize + m * m * 4),
        )(feats_p)

    # --- fall-back: upper-triangular tile-pair grid, mirrored in the wrapper.
    tmn, mp, nti, tk, kp, nk = _tiled_plan(m, k, itemsize, budget, tile_m)
    if nti > 1 and tmn % 128 != 0:
        raise ValueError("tiled gram needs tmn % 128 == 0 when nti > 1")
    feats_p = feats
    if mp != m or kp != k:
        feats_p = jnp.pad(feats, ((0, mp - m), (0, kp - k)))
    ii, jj, n_pairs = _upper_pairs(nti)

    g_up = pl.pallas_call(
        functools.partial(_gram_pairs_kernel, inv_gram_denom=inv_gram),
        out_shape=jax.ShapeDtypeStruct((mp, mp), jnp.float32),
        grid_spec=pltpu.PrefetchScalarGridSpec(
            num_scalar_prefetch=2, grid=(n_pairs, nk),
            in_specs=[
                pl.BlockSpec((tmn, tk), lambda p, kk, ii_r, jj_r: (ii_r[p], kk)),
                pl.BlockSpec((tmn, tk), lambda p, kk, ii_r, jj_r: (jj_r[p], kk)),
            ],
            out_specs=pl.BlockSpec((tmn, tmn),
                                   lambda p, kk, ii_r, jj_r: (ii_r[p], jj_r[p])),
            scratch_shapes=[pltpu.VMEM((tmn, tmn), jnp.float32)]),
        compiler_params=pltpu.CompilerParams(
            dimension_semantics=("parallel", "arbitrary"),
            vmem_limit_bytes=budget),
        cost_estimate=pl.CostEstimate(
            flops=2 * n_pairs * tmn * tmn * kp, transcendentals=0,
            bytes_accessed=n_pairs * (2 * tmn * kp * itemsize + tmn * tmn * 4)),
    )(ii, jj, feats_p, feats_p)

    # Mirror: lower-triangular elements come from the transposed upper tiles.
    rows = lax.broadcasted_iota(jnp.int32, (mp, mp), 0)
    cols = lax.broadcasted_iota(jnp.int32, (mp, mp), 1)
    g = jnp.where(rows <= cols, g_up, g_up.T)
    return g[:m, :m]


def style_loss_pallas(x, target_gram, *, max_vmem_bytes=None, force_tiled=False,
                      tile_m=None, cast_to_bf16=False):
    """mse_loss(gram_matrix(x), target_gram) without materializing gram(x)."""
    feats, b, h, w, f = _flatten(x)
    if cast_to_bf16 and feats.dtype == jnp.float32:
        feats = feats.astype(jnp.bfloat16)
    m, k = feats.shape
    itemsize = feats.dtype.itemsize
    budget = _vmem_budget(max_vmem_bytes)
    inv_gram = 1.0 / float(b * h * w * f)
    inv_mse = 1.0 / float(m * m)

    plan = None if force_tiled else _resident_plan(m, k, itemsize, budget)
    if plan is not None:
        kp, tk, nk = plan
        feats_p = feats if kp == k else jnp.pad(feats, ((0, 0), (0, kp - k)))
        tgt = target_gram.astype(jnp.float32)
        partials = pl.pallas_call(
            functools.partial(_loss_resident_kernel, inv_gram_denom=inv_gram),
            out_shape=jax.ShapeDtypeStruct((1, m), jnp.float32),
            grid_spec=pltpu.PrefetchScalarGridSpec(
                num_scalar_prefetch=0, grid=(nk,),
                in_specs=[pl.BlockSpec((m, tk), lambda kk: (0, kk)),
                          pl.BlockSpec((m, m), lambda kk: (0, 0))],
                out_specs=pl.BlockSpec((1, m), lambda kk: (0, 0)),
                scratch_shapes=[pltpu.VMEM((m, m), jnp.float32)]),
            compiler_params=pltpu.CompilerParams(
                dimension_semantics=("arbitrary",),
                vmem_limit_bytes=budget),
            cost_estimate=pl.CostEstimate(
                flops=2 * m * m * kp, transcendentals=0,
                bytes_accessed=feats_p.size * itemsize + m * m * 4 + m * 4),
        )(feats_p, tgt)
        return jnp.sum(partials) * inv_mse

    # --- fall-back: upper-triangular tile-pair grid with 2x off-diag weights.
    tmn, mp, nti, tk, kp, nk = _tiled_plan(m, k, itemsize, budget, tile_m)
    feats_p = feats
    if mp != m or kp != k:
        feats_p = jnp.pad(feats, ((0, mp - m), (0, kp - k)))
    tgt_p = target_gram.astype(jnp.float32)
    if mp != m:
        tgt_p = jnp.pad(tgt_p, ((0, mp - m), (0, mp - m)))
    ii, jj, n_pairs = _upper_pairs(nti)

    partials = pl.pallas_call(
        functools.partial(_loss_pairs_kernel, inv_gram_denom=inv_gram),
        out_shape=jax.ShapeDtypeStruct((n_pairs, tmn), jnp.float32),
        grid_spec=pltpu.PrefetchScalarGridSpec(
            num_scalar_prefetch=2, grid=(n_pairs, nk),
            in_specs=[
                pl.BlockSpec((tmn, tk), lambda p, kk, ii_r, jj_r: (ii_r[p], kk)),
                pl.BlockSpec((tmn, tk), lambda p, kk, ii_r, jj_r: (jj_r[p], kk)),
                pl.BlockSpec((tmn, tmn),
                             lambda p, kk, ii_r, jj_r: (ii_r[p], jj_r[p])),
            ],
            out_specs=pl.BlockSpec((1, tmn), lambda p, kk, ii_r, jj_r: (p, 0)),
            scratch_shapes=[pltpu.VMEM((tmn, tmn), jnp.float32)]),
        compiler_params=pltpu.CompilerParams(
            # per-pair partials -> pair axis is fully parallel (v7x megacore);
            # each core gets its own acc scratch, carried only across kk.
            dimension_semantics=("parallel", "arbitrary"),
            vmem_limit_bytes=budget),
        cost_estimate=pl.CostEstimate(
            flops=2 * n_pairs * tmn * tmn * kp, transcendentals=0,
            bytes_accessed=n_pairs * (2 * tmn * kp * itemsize
                                      + tmn * tmn * 4 + tmn * 4)),
    )(ii, jj, feats_p, feats_p, tgt_p)
    return jnp.sum(partials) * inv_mse


class StyleLossPallas:
    """JAX/Pallas port of the PyTorch StyleLoss module (forward only)."""

    def __init__(self, target_feature, **kwargs):
        self._kwargs = kwargs
        # target gram is a fixed "parameter" computed once (.detach()).
        self.target = jax.lax.stop_gradient(
            gram_matrix_pallas(target_feature, **kwargs))
        self.loss = jnp.float32(0.0)   # mse_loss(target, target) == 0

    def forward(self, x):
        # NOTE: stateful side effect mirrors the PyTorch module; the pure
        # functional path is style_loss_pallas(x, self.target).
        self.loss = style_loss_pallas(x, self.target, **self._kwargs)
        return x   # like the PyTorch module, forward returns the input unchanged


# ---------------------------------------------------------------------------
# Reference (plain jnp) for verification
# ---------------------------------------------------------------------------
def _gram_ref(x):
    b, h, w, f = x.shape
    feats = x.reshape(b * h, w * f).astype(jnp.float32)
    g = jnp.dot(feats, feats.T, precision=lax.Precision.HIGHEST)
    return g / (b * h * w * f)


if __name__ == "__main__":
    key = jax.random.PRNGKey(0)
    k1, k2, k3, k4 = jax.random.split(key, 4)

    # --- Test 1: small BHWF feature maps -> single-pass "resident" kernels --
    target_feature = jax.random.normal(k1, (2, 16, 16, 4), dtype=jnp.float32)
    x = jax.random.normal(k2, (2, 16, 16, 4), dtype=jnp.float32)

    module = StyleLossPallas(target_feature)
    out = jax.block_until_ready(module.forward(x))
    loss = jax.block_until_ready(module.loss)

    t_ref = _gram_ref(target_feature)
    g_ref = _gram_ref(x)
    loss_ref = jnp.mean((g_ref - t_ref) ** 2)

    assert out.shape == x.shape and jnp.allclose(out, x), "forward must return input"
    assert jnp.allclose(module.target, t_ref, atol=1e-6, rtol=1e-2), "target gram mismatch"
    assert jnp.allclose(loss, loss_ref, atol=1e-8, rtol=1e-2), "loss mismatch"

    # --- Test 2: force the tiled upper-triangular pair path (exercises the
    #     scalar-prefetched pair grid, 2x off-diag weighting and the mirror) --
    tf2 = jax.random.normal(k3, (2, 128, 4, 8), dtype=jnp.float32)  # M=256, K=32
    x2 = jax.random.normal(k4, (2, 128, 4, 8), dtype=jnp.float32)
    t2 = gram_matrix_pallas(tf2, force_tiled=True, tile_m=128)
    l2 = jax.block_until_ready(
        style_loss_pallas(x2, t2, force_tiled=True, tile_m=128))

    t2_ref = _gram_ref(tf2)
    l2_ref = jnp.mean((_gram_ref(x2) - t2_ref) ** 2)
    assert jnp.allclose(t2, t2_ref, atol=1e-6, rtol=1e-2), "tiled gram mismatch"
    assert jnp.allclose(l2, l2_ref, atol=1e-9, rtol=1e-2), "tiled loss mismatch"

    print("KERNEL_OK")
</pallas_src>

<mosaic_0001>
module attributes {stable_mosaic.version = 11 : i64} {
  func.func @_gram_resident_kernel(%arg0: i32, %arg1: memref<32x64xf32, #tpu.memory_space<vmem>>, %arg2: memref<32x32xf32, #tpu.memory_space<vmem>>, %arg3: memref<32x32xf32, #tpu.memory_space<vmem>>) attributes {dimension_semantics = [#tpu.dimension_semantics<arbitrary>], iteration_bounds = array<i64: 1>, scalar_prefetch = 0 : i64, scratch_operands = 1 : i64, tpu.core_type = #tpu.core_type<tc>, window_params = [{transform_indices = @transform_0, window_bounds = array<i64: 32, 64>}, {pipeline_mode = #tpu.pipeline_mode<synchronous>, transform_indices = @transform_1, window_bounds = array<i64: 32, 32>}]} {
    %c0_i32 = arith.constant 0 : i32
    %0 = arith.cmpi eq, %arg0, %c0_i32 : i32
    %1 = arith.extui %0 : i1 to i32
    %c0_i32_0 = arith.constant 0 : i32
    %2 = arith.cmpi ne, %1, %c0_i32_0 : i32
    scf.if %2 {
      %cst_8 = arith.constant 0.000000e+00 : f32
      %11 = vector.broadcast %cst_8 : f32 to vector<32x32xf32>
      %c0_9 = arith.constant 0 : index
      %c0_10 = arith.constant 0 : index
      %12 = vector.load %arg3[%c0_9, %c0_10] : memref<32x32xf32, #tpu.memory_space<vmem>>, vector<32x32xf32>
      tpu.vector_store %arg3[%c0_9, %c0_10], %11 {strides = array<i32>} : memref<32x32xf32, #tpu.memory_space<vmem>>, vector<32x32xf32>,
    } else {
    }
    %c0 = arith.constant 0 : index
    %c0_1 = arith.constant 0 : index
    %3 = vector.load %arg1[%c0, %c0_1] : memref<32x64xf32, #tpu.memory_space<vmem>>, vector<32x64xf32>
    %c0_2 = arith.constant 0 : index
    %c0_3 = arith.constant 0 : index
    %4 = vector.load %arg3[%c0_2, %c0_3] : memref<32x32xf32, #tpu.memory_space<vmem>>, vector<32x32xf32>
    %cst = arith.constant dense<0.000000e+00> : vector<32x32xf32>
    %5 = tpu.matmul %3, %3, %cst {dimension_numbers = #tpu.dot_dimension_numbers<[1], [1], [0], [0], [0, 0, 1, 0], [], []>} : vector<32x64xf32>, vector<32x64xf32>, vector<32x32xf32> -> vector<32x32xf32>
    %6 = arith.addf %4, %5 : vector<32x32xf32>
    %c0_4 = arith.constant 0 : index
    %c0_5 = arith.constant 0 : index
    %7 = vector.load %arg3[%c0_4, %c0_5] : memref<32x32xf32, #tpu.memory_space<vmem>>, vector<32x32xf32>
    tpu.vector_store %arg3[%c0_4, %c0_5], %6 {strides = array<i32>} : memref<32x32xf32, #tpu.memory_space<vmem>>, vector<32x32xf32>,
    %c0_i32_6 = arith.constant 0 : i32
    %8 = arith.cmpi eq, %arg0, %c0_i32_6 : i32
    %9 = arith.extui %8 : i1 to i32
    %c0_i32_7 = arith.constant 0 : i32
    %10 = arith.cmpi ne, %9, %c0_i32_7 : i32
    scf.if %10 {
      %c0_8 = arith.constant 0 : index
      %c0_9 = arith.constant 0 : index
      %11 = vector.load %arg3[%c0_8, %c0_9] : memref<32x32xf32, #tpu.memory_space<vmem>>, vector<32x32xf32>
      %cst_10 = arith.constant 4.8828125E-4 : f32
      %12 = vector.broadcast %cst_10 : f32 to vector<32x32xf32>
      %13 = arith.mulf %11, %12 : vector<32x32xf32>
      %c0_11 = arith.constant 0 : index
      %c0_12 = arith.constant 0 : index
      %14 = vector.load %arg2[%c0_11, %c0_12] : memref<32x32xf32, #tpu.memory_space<vmem>>, vector<32x32xf32>
      tpu.vector_store %arg2[%c0_11, %c0_12], %13 {strides = array<i32>} : memref<32x32xf32, #tpu.memory_space<vmem>>, vector<32x32xf32>,
    } else {
    }
    return
  }
  func.func @transform_0(%arg0: i32) -> (i32, i32) {
    %c0_i32 = arith.constant 0 : i32
    %c0_i32_0 = arith.constant 0 : i32
    return %c0_i32, %arg0 : i32, i32
  }
  func.func @transform_1(%arg0: i32) -> (i32, i32) {
    %c0_i32 = arith.constant 0 : i32
    %c0_i32_0 = arith.constant 0 : i32
    %c0_i32_1 = arith.constant 0 : i32
    return %c0_i32, %c0_i32_0 : i32, i32
  }
}

</mosaic_0001>

<bundles_post_ra>
// kernel: tpu_custom_call.1
= control target key start
LH: loop header
LB: loop body
LE: loop exit
PB: predicated region body
PF: predicated region fallthrough
CT: control target
= control target key end

     0   :  { %6 = vsyncpa [#allocation4], 0  ;;  %s361_s0 = inlined_call_operand.hbm [shape: f32[32,64], index: 0, kind: input, shape index: {}]   ;;  %s362_s1 = inlined_call_operand.hbm [shape: f32[32,32], index: 1, kind: output, shape index: {}]  }
   0x1   :  { %7 = vsyncpa [#allocation5], 0  ;;  %s278_s6 = smov [#allocation3]   ;;  %s230_s10 = scalar_lea.hbm %s361_s0, 512 }
   0x2   :  { %s13_s7 = sshll.u32 %s278_s6, 4  ;;  %p231_p0 = scmp.ne.s32.totalorder %s361_s0, %s230_s10  ;;  %s14_s7 = int_to_ptr.vmem [resolvable:$true] %s13_s7 }
   0x3   :  { %p234_p1 = scmp.lt.u32.totalorder %s230_s10, %s361_s0 }
   0x5   :  { %p236_p2 = pnand %p234_p1, %p231_p0 }
   0x7   :  { %239 = shalt.err (!%p236_p2)
}
   0x8   :  { %s240_s15 = scalar_lea.vmem %s14_s7, 512  ;;  %p245_p4 = scmp.lt.s32.totalorder %s14_s7, %s14_s7 }
   0x9   :  { %p241_p3 = scmp.ne.s32.totalorder %s14_s7, %s240_s15  ;;  %p246_p5 = scmp.lt.s32.totalorder %s240_s15, %s240_s15 }
   0xb   :  { %p247_p6 = por %p246_p5, %p245_p4 }
   0xd   :  { %p248_p7 = pnand %p247_p6, %p241_p3 }
   0xf   :  { %251 = shalt.err (!%p248_p7)
}
  0x10   :  { %s279_s16 = smov 128   ;;  %s280_s17 = smov 8  }
  0x11   :  { %19 = dma.hbm_to_vmem [thread:$0]  %s361_s0, 512, %s14_s7, [#allocation4], %s279_s16, %s279_s16, %s280_s17  }
  0x12   :  { %274 = dma.done.wait [#allocation4], 512  }
  0x13   :  { %275 = vsyncadd [#allocation4], 4294966784  ;;  %vm27_vm0 = vcmask 261120   ;;  %v281_v0 = vmov 0.0   ;;  %vm40_vm1 = vcmask 523264   ;;  %v32_v2 = vld [vmem:[#allocation3] sm:$0xff] }
  0x14   :  { %29 = vst.msk [vmem:[#allocation2 + $0x8] sm:$0xff] %vm27_vm0, %v281_v0  ;;  %28 = vst.msk [vmem:[#allocation2] sm:$0xff] %vm27_vm0, %v281_v0  ;;  %v33_v3 = vld [vmem:[#allocation3 + $0x8] sm:$0xff]  ;;  %v34_v4 = vld [vmem:[#allocation3 + $0x10] sm:$0xff]  ;;  %203 = vmatprep.mubr.msk.f32.mxu0 %vm40_vm1, %v32_v2  ;;  %s282_s0 = smov [#allocation6]  }
  0x15   :  { %30 = vst.msk [vmem:[#allocation2 + $0x10] sm:$0xff] %vm27_vm0, %v281_v0  ;;  %31 = vst.msk [vmem:[#allocation2 + $0x18] sm:$0xff] %vm27_vm0, %v281_v0  ;;  %v209_v5 = vpack.c.bf16 %v33_v3, %v32_v2  ;;  %v35_v6 = vld [vmem:[#allocation3 + $0x18] sm:$0xff]  ;;  %206 = vmatprep.mubr.msk.f32.mxu1 %vm40_vm1, %v34_v4  ;;  %s167_s20 = sshll.u32 %s282_s0, 4  ;;  %s168_s20 = int_to_ptr.vmem [resolvable:$true] %s167_s20 }
  0x16   :  { %vm314_vm2 = vmpackc.low %vm40_vm1, %vm40_vm1  ;;  %v215_v7 = vpack.c.bf16 %v35_v6, %v34_v4  ;;  %s252_s21 = scalar_lea.vmem %s168_s20, 512  ;;  %p257_p9 = scmp.lt.s32.totalorder %s168_s20, %s168_s20 }
  0x17   :  { %211 = vmatprep.subr.msk.bf16.mxu0 %vm314_vm2, %v209_v5  ;;  %221 = vmatprep.subr.msk.bf16.mxu1 %vm314_vm2, %v209_v5  ;;  %p253_p8 = scmp.ne.s32.totalorder %s168_s20, %s252_s21  ;;  %p258_p10 = scmp.lt.s32.totalorder %s252_s21, %s252_s21 }
  0x18   :  { %214 = vmatpush3.bf16.xpose.msk.msra.mxu0 %vm314_vm2, %v209_v5  ;;  %223 = vmatpush3.bf16.xpose.msk.msra.mxu1 %vm314_vm2, %v209_v5 }
  0x19   :  { %217 = vmatprep.subr.msk.bf16.mxu0 %vm314_vm2, %v215_v7  ;;  %222 = vmatprep.subr.msk.bf16.mxu1 %vm314_vm2, %v215_v7  ;;  %p259_p11 = por %p258_p10, %p257_p9 }
  0x1b   :  { %v37_v8 = vld [vmem:[#allocation2 + $0x8] sm:$0xff]  ;;  %v36_v10 = vld [vmem:[#allocation2] sm:$0xff]  ;;  %p260_p12 = pnand %p259_p11, %p253_p8 }
  0x1c   :  { %v39_v9 = vld [vmem:[#allocation2 + $0x18] sm:$0xff]  ;;  %v38_v11 = vld [vmem:[#allocation2 + $0x10] sm:$0xff] }
  0x20   :  { %220 = vmatpush3.bf16.xpose.msk.msra.mxu0 %vm314_vm2, %v215_v7  ;;  %224 = vmatpush3.bf16.xpose.msk.msra.mxu1 %vm314_vm2, %v215_v7 }
  0x27   :  { %204 = vmatmul.mubr.msk.f32.vlgmr.msra.gmra.mrb[0].mxu0 %vm40_vm1, %v33_v3  ;;  %207 = vmatmul.mubr.msk.f32.vlgmr.msra.gmra.mrb[0].mxu1 %vm40_vm1, %v35_v6 }
  0xfa   :  { %v205_v12 = vpop.f32.mrb[0].mxu0  ;;  %v208_v13 = vpop.f32.mrb[0].mxu1 }
  0xfb   :  { %v139_v14 = vadd.f32 %v205_v12, %v37_v8  ;;  %v141_v15 = vadd.f32 %v208_v13, %v39_v9  ;;  %v119_v16 = vpop.f32.mrb[1].mxu0  ;;  %v129_v17 = vpop.f32.mrb[1].mxu1 }
  0xfc   :  { %v138_v18 = vadd.f32 %v119_v16, %v36_v10  ;;  %v140_v19 = vadd.f32 %v129_v17, %v38_v11 }
  0xfd   :  { %144 = vst.msk [vmem:[#allocation2 + $0x8] sm:$0xff] %vm27_vm0, %v139_v14  ;;  %146 = vst.msk [vmem:[#allocation2 + $0x18] sm:$0xff] %vm27_vm0, %v141_v15 }
  0xfe   :  { %143 = vst.msk [vmem:[#allocation2] sm:$0xff] %vm27_vm0, %v138_v18  ;;  %145 = vst.msk [vmem:[#allocation2 + $0x10] sm:$0xff] %vm27_vm0, %v140_v19 }
 0x104   :  { %v151_v20 = vld [vmem:[#allocation2 + $0x8] sm:$0xff]  ;;  %v153_v21 = vld [vmem:[#allocation2 + $0x18] sm:$0xff] }
 0x105   :  { %v150_v22 = vld [vmem:[#allocation2] sm:$0xff]  ;;  %v152_v23 = vld [vmem:[#allocation2 + $0x10] sm:$0xff]  ;;  %v155_v24 = vmul.f32 0.00048828125, %v151_v20  ;;  %v157_v25 = vmul.f32 0.00048828125, %v153_v21 }
 0x106   :  { %v154_v26 = vmul.f32 0.00048828125, %v150_v22  ;;  %v156_v27 = vmul.f32 0.00048828125, %v152_v23 }
 0x107   :  { %159 = vst.msk [vmem:[#allocation6 + $0x8] sm:$0xff] %vm27_vm0, %v155_v24  ;;  %161 = vst.msk [vmem:[#allocation6 + $0x18] sm:$0xff] %vm27_vm0, %v157_v25 }
 0x108   :  { %158 = vst.msk [vmem:[#allocation6] sm:$0xff] %vm27_vm0, %v154_v26  ;;  %160 = vst.msk [vmem:[#allocation6 + $0x10] sm:$0xff] %vm27_vm0, %v156_v27 }
 0x109   :  { %263 = shalt.err (!%p260_p12)
}
 0x10a   :  { %s264_s24 = scalar_lea.hbm %s362_s1, 512 }
 0x10b   :  { %p265_p13 = scmp.ne.s32.totalorder %s362_s1, %s264_s24  ;;  %p268_p0 = scmp.lt.u32.totalorder %s264_s24, %s362_s1 }
 0x10d   :  { %p270_p1 = pnand %p268_p0, %p265_p13 }
 0x10f   :  { %273 = shalt.err (!%p270_p1)
}
 0x110   :  { %173 = dma.vmem_to_hbm [thread:$0]  %s168_s20, 512, %s362_s1, [#allocation5], %s279_s16, %s279_s16, %s280_s17  }
 0x111   :  { %276 = dma.done.wait [#allocation5], 512  }
 0x112   :  { %277 = vsyncadd [#allocation5], 4294966784 }
 0x113   :  { %177 = vsyncpa [#allocation4], 1 }
 0x114   :  { %178 = vsyncpa [#allocation5], 1 }

</bundles_post_ra>
